<compile_context>
chip_gen: v6e
topology: v6e:2x2x1
jax: 0.10.0
libtpu: 0.0.40
codegen_flags: <defaults>
</compile_context>

<pallas_src>
import jax
import jax.numpy as jnp
from jax import lax
from jax.experimental import pallas as pl
from jax.experimental.pallas import tpu as pltpu


def _round_up(a: int, m: int) -> int:
    return ((a + m - 1) // m) * m


def _block_vsv_kernel(x_ref, w_ref, b_ref, v_ref, lam_ref, o_ref, acc_ref):
    """Grid = (M tiles, K tiles). Accumulate x@W over K, finalize VSV at last K."""
    k = pl.program_id(1)

    @pl.when(k == 0)
    def _():
        acc_ref[...] = jnp.zeros_like(acc_ref)

    # Native-dtype MXU matmul with fp32 accumulation (no fp32 upcast of x/W).
    acc_ref[...] += jnp.dot(
        x_ref[...], w_ref[...], preferred_element_type=jnp.float32
    )

    @pl.when(k == pl.num_programs(1) - 1)
    def _():
        # --- finalize: bias + VSV steering in fp32 (matches x.float()) ---
        h = acc_ref[...] + b_ref[...].astype(jnp.float32)
        lam = lam_ref[0, 0]
        y = h + lam * v_ref[...].astype(jnp.float32)

        sum_h2 = jnp.sum(h * h, axis=-1, keepdims=True)
        sum_y2 = jnp.sum(y * y, axis=-1, keepdims=True)
        # torch F.normalize: y / max(||y||, 1e-12) * ||h||
        #   == y * sqrt(||h||^2) * rsqrt(max(||y||^2, 1e-24))
        scale = jnp.sqrt(sum_h2) * lax.rsqrt(
            jnp.maximum(sum_y2, jnp.float32(1e-24))
        )
        o_ref[...] = (y * scale).astype(o_ref.dtype)


def block_post_vsv(x, w, b, vsv_l, lam, *, tile_m=256, tile_k=512):
    """x: [B, T, D]; w: [D, D]; b: [D]; vsv_l: [D]; lam: scalar. Returns [B, T, D]."""
    B, T, D = x.shape
    M = B * T
    out_dtype = x.dtype

    # --- tile sizing -------------------------------------------------------
    tile_k = min(tile_k, D)
    if D % tile_k != 0:
        # Fall back to full-K (single reduction step) when D has no clean tile.
        tile_k = D
    # tile_m a multiple of 32 (bf16/int8 sublane packing friendly), pad tail.
    tile_m = min(tile_m, _round_up(M, 32))
    M_pad = _round_up(M, tile_m)

    # --- operand prep ------------------------------------------------------
    x2 = x.reshape(M, D)
    if M_pad != M:
        x2 = jnp.pad(x2, ((0, M_pad - M), (0, 0)))
    w = w.astype(x.dtype)                       # feed MXU in native input dtype
    b2 = b.reshape(1, D).astype(jnp.float32)
    v2 = vsv_l.reshape(1, D).astype(jnp.float32)
    lam_arr = jnp.full((1, 1), lam, dtype=jnp.float32)   # SMEM scalar, no recompile

    grid = (M_pad // tile_m, D // tile_k)

    # --- VMEM budget / scoped limit ---------------------------------------
    itm = x2.dtype.itemsize
    oitm = jnp.dtype(out_dtype).itemsize
    est = (
        2 * tile_m * tile_k * itm      # x tile, double-buffered
        + 2 * tile_k * D * itm         # W tile, double-buffered
        + 2 * tile_m * D * oitm        # out tile, double-buffered
        + tile_m * D * 4               # fp32 accumulator scratch
        + 4 * D * 4                    # bias + steering vector
    )
    vmem_limit = int(min(max(est * 3 // 2, 32 << 20), 56 << 20))

    cost = pl.CostEstimate(
        flops=2 * M_pad * D * D,
        transcendentals=2 * M_pad,
        bytes_accessed=x2.size * itm + w.size * itm + M_pad * D * oitm,
    )

    out2 = pl.pallas_call(
        _block_vsv_kernel,
        out_shape=jax.ShapeDtypeStruct((M_pad, D), out_dtype),
        grid_spec=pltpu.PrefetchScalarGridSpec(
            num_scalar_prefetch=0,
            grid=grid,
            in_specs=[
                pl.BlockSpec((tile_m, tile_k), lambda i, k: (i, k)),   # x rows
                pl.BlockSpec((tile_k, D), lambda i, k: (k, 0)),        # W k-slab
                pl.BlockSpec((1, D), lambda i, k: (0, 0)),             # bias
                pl.BlockSpec((1, D), lambda i, k: (0, 0)),             # steering v
                pl.BlockSpec(memory_space=pltpu.MemorySpace.SMEM),     # lam scalar
            ],
            out_specs=pl.BlockSpec((tile_m, D), lambda i, k: (i, 0)),
            scratch_shapes=[pltpu.VMEM((tile_m, D), jnp.float32)],
        ),
        compiler_params=pltpu.CompilerParams(
            dimension_semantics=("parallel", "arbitrary"),
            vmem_limit_bytes=vmem_limit,
        ),
        cost_estimate=cost,
    )(x2, w, b2, v2, lam_arr)

    return out2[:M].reshape(B, T, D)


def _reference(x, w, b, vsv_l, lam):
    """Pure-JAX reference mirroring the PyTorch forward (block = dense proj)."""
    h = jnp.einsum("btd,de->bte", x, w.astype(x.dtype))
    h = h.astype(jnp.float32) + b.astype(jnp.float32)
    orig_dtype = x.dtype
    n0 = jnp.linalg.norm(h, axis=-1, keepdims=True)
    y = h + jnp.float32(lam) * vsv_l.astype(jnp.float32).reshape(1, 1, -1)
    yn = jnp.linalg.norm(y, axis=-1, keepdims=True)
    y = y / jnp.maximum(yn, 1e-12) * n0
    return y.astype(orig_dtype)


if __name__ == "__main__":
    B, T, D = 2, 8, 32
    lam = 0.5

    key = jax.random.PRNGKey(0)
    kx, kw, kb, kv = jax.random.split(key, 4)

    x = jax.random.normal(kx, (B, T, D), dtype=jnp.float32)
    # Deterministic parameter init (synthetic "block" weights + steering vec).
    w = jax.random.normal(kw, (D, D), dtype=jnp.float32) * 0.1
    b = jax.random.normal(kb, (D,), dtype=jnp.float32) * 0.01
    vsv_l = jax.random.normal(kv, (D,), dtype=jnp.float32)

    out = block_post_vsv(x, w, b, vsv_l, lam)
    out = jax.block_until_ready(out)

    ref = _reference(x, w, b, vsv_l, lam)
    assert out.shape == (B, T, D)
    max_err = float(jnp.max(jnp.abs(out.astype(jnp.float32) - ref.astype(jnp.float32))))
    # Native-dtype MXU matmul (default precision) can drift slightly vs the
    # XLA einsum reference; tolerance loosened accordingly.
    assert max_err < 2e-2, f"mismatch vs reference: max err {max_err}"

    print("KERNEL_OK")
</pallas_src>

<mosaic_0001>
module attributes {stable_mosaic.version = 11 : i64} {
  func.func @_block_vsv_kernel(%arg0: i32, %arg1: i32, %arg2: memref<32x32xf32, #tpu.memory_space<vmem>>, %arg3: memref<32x32xf32, #tpu.memory_space<vmem>>, %arg4: memref<1x32xf32, #tpu.memory_space<vmem>>, %arg5: memref<1x32xf32, #tpu.memory_space<vmem>>, %arg6: memref<1x1xf32, #tpu.memory_space<smem>>, %arg7: memref<32x32xf32, #tpu.memory_space<vmem>>, %arg8: memref<32x32xf32, #tpu.memory_space<vmem>>) attributes {dimension_semantics = [#tpu.dimension_semantics<parallel>, #tpu.dimension_semantics<arbitrary>], iteration_bounds = array<i64: 1, 1>, scalar_prefetch = 0 : i64, scratch_operands = 1 : i64, tpu.core_type = #tpu.core_type<tc>, window_params = [{transform_indices = @transform_0, window_bounds = array<i64: 32, 32>}, {transform_indices = @transform_1, window_bounds = array<i64: 32, 32>}, {pipeline_mode = #tpu.pipeline_mode<synchronous>, transform_indices = @transform_2, window_bounds = array<i64: 1, 32>}, {pipeline_mode = #tpu.pipeline_mode<synchronous>, transform_indices = @transform_3, window_bounds = array<i64: 1, 32>}, {transform_indices = @transform_4, window_bounds = array<i64: 1, 1>}, {transform_indices = @transform_5, window_bounds = array<i64: 32, 32>}]} {
    %c0_i32 = arith.constant 0 : i32
    %0 = arith.cmpi eq, %arg1, %c0_i32 : i32
    %1 = arith.extui %0 : i1 to i32
    %c0_i32_0 = arith.constant 0 : i32
    %2 = arith.cmpi ne, %1, %c0_i32_0 : i32
    scf.if %2 {
      %cst_10 = arith.constant 0.000000e+00 : f32
      %12 = vector.broadcast %cst_10 : f32 to vector<32x32xf32>
      %c0_11 = arith.constant 0 : index
      %c0_12 = arith.constant 0 : index
      %13 = vector.load %arg8[%c0_11, %c0_12] : memref<32x32xf32, #tpu.memory_space<vmem>>, vector<32x32xf32>
      tpu.vector_store %arg8[%c0_11, %c0_12], %12 {strides = array<i32>} : memref<32x32xf32, #tpu.memory_space<vmem>>, vector<32x32xf32>,
    } else {
    }
    %c0 = arith.constant 0 : index
    %c0_1 = arith.constant 0 : index
    %3 = vector.load %arg8[%c0, %c0_1] : memref<32x32xf32, #tpu.memory_space<vmem>>, vector<32x32xf32>
    %c0_2 = arith.constant 0 : index
    %c0_3 = arith.constant 0 : index
    %4 = vector.load %arg2[%c0_2, %c0_3] : memref<32x32xf32, #tpu.memory_space<vmem>>, vector<32x32xf32>
    %c0_4 = arith.constant 0 : index
    %c0_5 = arith.constant 0 : index
    %5 = vector.load %arg3[%c0_4, %c0_5] : memref<32x32xf32, #tpu.memory_space<vmem>>, vector<32x32xf32>
    %cst = arith.constant dense<0.000000e+00> : vector<32x32xf32>
    %6 = tpu.matmul %4, %5, %cst {dimension_numbers = #tpu.dot_dimension_numbers<[1], [0], [0], [1], [0, 0, 1, 1], [], []>} : vector<32x32xf32>, vector<32x32xf32>, vector<32x32xf32> -> vector<32x32xf32>
    %7 = arith.addf %3, %6 : vector<32x32xf32>
    %c0_6 = arith.constant 0 : index
    %c0_7 = arith.constant 0 : index
    %8 = vector.load %arg8[%c0_6, %c0_7] : memref<32x32xf32, #tpu.memory_space<vmem>>, vector<32x32xf32>
    tpu.vector_store %arg8[%c0_6, %c0_7], %7 {strides = array<i32>} : memref<32x32xf32, #tpu.memory_space<vmem>>, vector<32x32xf32>,
    %c0_i32_8 = arith.constant 0 : i32
    %9 = arith.cmpi eq, %arg1, %c0_i32_8 : i32
    %10 = arith.extui %9 : i1 to i32
    %c0_i32_9 = arith.constant 0 : i32
    %11 = arith.cmpi ne, %10, %c0_i32_9 : i32
    scf.if %11 {
      %c0_10 = arith.constant 0 : index
      %c0_11 = arith.constant 0 : index
      %12 = vector.load %arg8[%c0_10, %c0_11] : memref<32x32xf32, #tpu.memory_space<vmem>>, vector<32x32xf32>
      %c0_12 = arith.constant 0 : index
      %c0_13 = arith.constant 0 : index
      %13 = vector.load %arg4[%c0_12, %c0_13] : memref<1x32xf32, #tpu.memory_space<vmem>>, vector<1x32xf32>
      %14 = vector.broadcast %13 : vector<1x32xf32> to vector<32x32xf32>
      %15 = arith.addf %12, %14 : vector<32x32xf32>
      %c0_14 = arith.constant 0 : index
      %c0_15 = arith.constant 0 : index
      %16 = memref.load %arg6[%c0_14, %c0_15] : memref<1x1xf32, #tpu.memory_space<smem>>
      %c0_16 = arith.constant 0 : index
      %c0_17 = arith.constant 0 : index
      %17 = vector.load %arg5[%c0_16, %c0_17] : memref<1x32xf32, #tpu.memory_space<vmem>>, vector<1x32xf32>
      %18 = vector.broadcast %16 : f32 to vector<1x32xf32>
      %19 = arith.mulf %18, %17 : vector<1x32xf32>
      %20 = vector.broadcast %19 : vector<1x32xf32> to vector<32x32xf32>
      %21 = arith.addf %15, %20 : vector<32x32xf32>
      %22 = arith.mulf %15, %15 : vector<32x32xf32>
      %cst_18 = arith.constant dense<0.000000e+00> : vector<32xf32>
      %23 = vector.multi_reduction <add>, %22, %cst_18 [1] : vector<32x32xf32> to vector<32xf32>
      %24 = vector.shape_cast %23 : vector<32xf32> to vector<32x1xf32>
      %25 = arith.mulf %21, %21 : vector<32x32xf32>
      %cst_19 = arith.constant dense<0.000000e+00> : vector<32xf32>
      %26 = vector.multi_reduction <add>, %25, %cst_19 [1] : vector<32x32xf32> to vector<32xf32>
      %27 = vector.shape_cast %26 : vector<32xf32> to vector<32x1xf32>
      %28 = math.sqrt %24 : vector<32x1xf32>
      %cst_20 = arith.constant 1.000000e-24 : f32
      %29 = vector.broadcast %cst_20 : f32 to vector<32x1xf32>
      %30 = arith.maximumf %27, %29 : vector<32x1xf32>
      %31 = math.rsqrt %30 : vector<32x1xf32>
      %32 = arith.mulf %28, %31 : vector<32x1xf32>
      %33 = vector.broadcast %32 : vector<32x1xf32> to vector<32x32xf32>
      %34 = arith.mulf %21, %33 : vector<32x32xf32>
      %c0_21 = arith.constant 0 : index
      %c0_22 = arith.constant 0 : index
      %35 = vector.load %arg7[%c0_21, %c0_22] : memref<32x32xf32, #tpu.memory_space<vmem>>, vector<32x32xf32>
      tpu.vector_store %arg7[%c0_21, %c0_22], %34 {strides = array<i32>} : memref<32x32xf32, #tpu.memory_space<vmem>>, vector<32x32xf32>,
    } else {
    }
    return
  }
  func.func @transform_0(%arg0: i32, %arg1: i32) -> (i32, i32) {
    %c0_i32 = arith.constant 0 : i32
    return %arg0, %arg1 : i32, i32
  }
  func.func @transform_1(%arg0: i32, %arg1: i32) -> (i32, i32) {
    %c0_i32 = arith.constant 0 : i32
    %c0_i32_0 = arith.constant 0 : i32
    return %arg1, %c0_i32 : i32, i32
  }
  func.func @transform_2(%arg0: i32, %arg1: i32) -> (i32, i32) {
    %c0_i32 = arith.constant 0 : i32
    %c0_i32_0 = arith.constant 0 : i32
    %c0_i32_1 = arith.constant 0 : i32
    return %c0_i32, %c0_i32_0 : i32, i32
  }
  func.func @transform_3(%arg0: i32, %arg1: i32) -> (i32, i32) {
    %c0_i32 = arith.constant 0 : i32
    %c0_i32_0 = arith.constant 0 : i32
    %c0_i32_1 = arith.constant 0 : i32
    return %c0_i32, %c0_i32_0 : i32, i32
  }
  func.func @transform_4(%arg0: i32, %arg1: i32) -> (i32, i32) {
    %c0_i32 = arith.constant 0 : i32
    %c0_i32_0 = arith.constant 0 : i32
    %c0_i32_1 = arith.constant 0 : i32
    return %c0_i32, %c0_i32_0 : i32, i32
  }
  func.func @transform_5(%arg0: i32, %arg1: i32) -> (i32, i32) {
    %c0_i32 = arith.constant 0 : i32
    %c0_i32_0 = arith.constant 0 : i32
    return %arg0, %c0_i32 : i32, i32
  }
}

</mosaic_0001>

<bundles_post_ra>
// kernel: tpu_custom_call.1
= control target key start
LH: loop header
LB: loop body
LE: loop exit
PB: predicated region body
PF: predicated region fallthrough
CT: control target
= control target key end

     0   :  { %11 = vsyncpa [#allocation5], 0  ;;  %s537_s0 = inlined_call_operand.hbm [shape: f32[32,32], index: 0, kind: input, shape index: {}]   ;;  %s538_s1 = inlined_call_operand.hbm [shape: f32[32,32], index: 1, kind: input, shape index: {}]   ;;  %s539_s2 = inlined_call_operand.vmem [shape: f32[1,32], index: 2, kind: input, shape index: {}]   ;;  %s540_s3 = inlined_call_operand.vmem [shape: f32[1,32], index: 3, kind: input, shape index: {}]   ;;  %s541_s4 = inlined_call_operand.<no memory space> [shape: f32[1,1], index: 4, kind: input, shape index: {}]   ;;  %s542_s5 = inlined_call_operand.hbm [shape: f32[32,32], index: 5, kind: output, shape index: {}]  }
   0x1   :  { %12 = vsyncpa [#allocation8], 0 }
   0x2   :  { %13 = vsyncpa [#allocation6], 0  ;;  %s430_s18 = smov [#allocation4]  }
   0x3   :  { %s19_s19 = sshll.u32 %s430_s18, 4  ;;  %s20_s19 = int_to_ptr.vmem [resolvable:$true] %s19_s19 }
   0x4   :  { %s372_s20 = scalar_lea.vmem %s20_s19, 512  ;;  %p377_p1 = scmp.lt.s32.totalorder %s20_s19, %s20_s19 }
   0x5   :  { %p373_p0 = scmp.ne.s32.totalorder %s20_s19, %s372_s20  ;;  %p378_p2 = scmp.lt.s32.totalorder %s372_s20, %s372_s20 }
   0x7   :  { %p379_p3 = por %p378_p2, %p377_p1 }
   0x9   :  { %p380_p4 = pnand %p379_p3, %p373_p0 }
   0xb   :  { %383 = shalt.err (!%p380_p4)
}
   0xc   :  { %s431_s21 = smov 128   ;;  %s432_s22 = smov 8  }
   0xd   :  { %25 = dma.hbm_to_vmem [thread:$0]  %s537_s0, 512, %s20_s19, [#allocation5], %s431_s21, %s431_s21, %s432_s22  }
   0xe   :  { %s433_s25 = smov [#allocation7]  }
   0xf   :  { %s31_s26 = sshll.u32 %s433_s25, 4  ;;  %s32_s26 = int_to_ptr.vmem [resolvable:$true] %s31_s26 }
  0x10   :  { %s392_s27 = scalar_lea.vmem %s32_s26, 512  ;;  %p397_p6 = scmp.lt.s32.totalorder %s32_s26, %s32_s26 }
  0x11   :  { %p393_p5 = scmp.ne.s32.totalorder %s32_s26, %s392_s27  ;;  %p398_p7 = scmp.lt.s32.totalorder %s392_s27, %s392_s27 }
  0x13   :  { %p399_p8 = por %p398_p7, %p397_p6 }
  0x15   :  { %p400_p9 = pnand %p399_p8, %p393_p5 }
  0x17   :  { %403 = shalt.err (!%p400_p9)
}
  0x18   :  { %37 = dma.hbm_to_vmem [thread:$0]  %s538_s1, 512, %s32_s26, [#allocation8], %s431_s21, %s431_s21, %s432_s22  }
  0x19   :  { %424 = dma.done.wait [#allocation5], 512  }
  0x1a   :  { %425 = vsyncadd [#allocation5], 4294966784 }
  0x1b   :  { %426 = dma.done.wait [#allocation8], 512  }
  0x1c   :  { %427 = vsyncadd [#allocation8], 4294966784  ;;  %vm54_vm0 = vcmask 261120   ;;  %v434_v0 = vmov 0.0   ;;  %v70_v1 = vld [vmem:[#allocation7 + $0x18] sm:$0xff]  ;;  %v69_v2 = vld [vmem:[#allocation7 + $0x10] sm:$0xff]  ;;  %v200_v11 = vlaneseq  ;;  %v197_v24 = vstv %s541_s4 }
  0x1d   :  { %56 = vst.msk [vmem:[#allocation2 + $0x8] sm:$0xff] %vm54_vm0, %v434_v0  ;;  %55 = vst.msk [vmem:[#allocation2] sm:$0xff] %vm54_vm0, %v434_v0  ;;  %320 = vmatprep.subr.mxu0 %v70_v1  ;;  %334 = vmatprep.subr.mxu1 %v70_v1  ;;  %v68_v3 = vld [vmem:[#allocation7 + $0x8] sm:$0xff]  ;;  %v67_v4 = vld [vmem:[#allocation7] sm:$0xff] }
  0x1e   :  { %57 = vst.msk [vmem:[#allocation2 + $0x10] sm:$0xff] %vm54_vm0, %v434_v0  ;;  %58 = vst.msk [vmem:[#allocation2 + $0x18] sm:$0xff] %vm54_vm0, %v434_v0  ;;  %321 = vmatpush3.msra.mxu0 %v70_v1  ;;  %338 = vmatpush3.msra.mxu1 %v70_v1  ;;  %v63_v5 = vld [vmem:[#allocation4] sm:$0xff]  ;;  %v65_v6 = vld [vmem:[#allocation4 + $0x10] sm:$0xff]  ;;  %v201_v20 = vshrl.u32 %v200_v11, 7 }
  0x1f   :  { %322 = vmatprep.subr.mxu0 %v69_v2  ;;  %335 = vmatprep.subr.mxu1 %v69_v2  ;;  %v64_v7 = vld [vmem:[#allocation4 + $0x8] sm:$0xff]  ;;  %v66_v8 = vld [vmem:[#allocation4 + $0x18] sm:$0xff]  ;;  %v196_v23 = vld [vmem:[%s540_s3] sm:$0x1] }
  0x20   :  { %323 = vmatpush3.msra.mxu0 %v69_v2  ;;  %339 = vmatpush3.msra.mxu1 %v69_v2  ;;  %v198_v25 = vmul.f32 %v197_v24, %v196_v23  ;;  %v202_v26 = vsub.s32 0, %v201_v20  ;;  %v311_v27 = vld [vmem:[%s539_s2] ss:$0 sm:$0xff]  ;;  %s435_s2 = smov [#allocation9]  }
  0x21   :  { %324 = vmatprep.subr.mxu0 %v68_v3  ;;  %336 = vmatprep.subr.mxu1 %v68_v3  ;;  %s294_s3 = sshll.u32 %s435_s2, 4  ;;  %s295_s3 = int_to_ptr.vmem [resolvable:$true] %s294_s3 }
  0x22   :  { %325 = vmatpush3.msra.mxu0 %v68_v3  ;;  %340 = vmatpush3.msra.mxu1 %v68_v3  ;;  %v203_v30 = vrot.slane %v198_v25, %v202_v26  ;;  %s404_s4 = scalar_lea.vmem %s295_s3, 512  ;;  %p409_p11 = scmp.lt.s32.totalorder %s295_s3, %s295_s3 }
  0x23   :  { %326 = vmatprep.subr.mxu0 %v67_v4  ;;  %337 = vmatprep.subr.mxu1 %v67_v4  ;;  %p405_p10 = scmp.ne.s32.totalorder %s295_s3, %s404_s4  ;;  %p410_p12 = scmp.lt.s32.totalorder %s404_s4, %s404_s4 }
  0x24   :  { %327 = vmatpush3.msra.mxu0 %v67_v4  ;;  %341 = vmatpush3.msra.mxu1 %v67_v4  ;;  %v60_v9 = vld [vmem:[#allocation2 + $0x8] sm:$0xff]  ;;  %v59_v14 = vld [vmem:[#allocation2] sm:$0xff] }
  0x25   :  { %328 = vmatprep.mubr.msk.f32.mxu0 %vm54_vm0, %v63_v5  ;;  %331 = vmatprep.mubr.msk.f32.mxu1 %vm54_vm0, %v65_v6  ;;  %v62_v10 = vld [vmem:[#allocation2 + $0x18] sm:$0xff]  ;;  %v61_v15 = vld [vmem:[#allocation2 + $0x10] sm:$0xff]  ;;  %p411_p13 = por %p410_p12, %p409_p11 }
  0x26   :  { %329 = vmatmul.mubr.msk.f32.vlgmr.msra.gmra.mxu0 %vm54_vm0, %v64_v7  ;;  %332 = vmatmul.mubr.msk.f32.vlgmr.msra.gmra.mxu1 %vm54_vm0, %v66_v8 }
  0x27   :  { %p412_p0 = pnand %p411_p13, %p405_p10 }
  0xe6   :  { %v330_v12 = vpop.f32.mrf.mxu0  ;;  %v333_v13 = vpop.f32.mrf.mxu1 }
  0xe7   :  { %v170_v16 = vadd.f32 %v330_v12, %v60_v9  ;;  %v172_v17 = vadd.f32 %v333_v13, %v62_v10 }
  0xe8   :  { %v150_v18 = vpop.f32.mrf.mxu0  ;;  %v160_v19 = vpop.f32.mrf.mxu1 }
  0xe9   :  { %174 = vst.msk [vmem:[#allocation2 + $0x8] sm:$0xff] %vm54_vm0, %v170_v16  ;;  %176 = vst.msk [vmem:[#allocation2 + $0x18] sm:$0xff] %vm54_vm0, %v172_v17  ;;  %v169_v21 = vadd.f32 %v150_v18, %v59_v14  ;;  %v171_v22 = vadd.f32 %v160_v19, %v61_v15 }
  0xeb   :  { %173 = vst.msk [vmem:[#allocation2] sm:$0xff] %vm54_vm0, %v169_v21  ;;  %175 = vst.msk [vmem:[#allocation2 + $0x10] sm:$0xff] %vm54_vm0, %v171_v22 }
  0xf0   :  { %v183_v28 = vld [vmem:[#allocation2 + $0x18] sm:$0xff]  ;;  %v181_v29 = vld [vmem:[#allocation2 + $0x8] sm:$0xff] }
  0xf1   :  { %v194_v31 = vadd.f32 %v311_v27, %v183_v28  ;;  %v192_v32 = vadd.f32 %v311_v27, %v181_v29 }
  0xf2   :  { %v182_v33 = vld [vmem:[#allocation2 + $0x10] sm:$0xff]  ;;  %v180_v34 = vld [vmem:[#allocation2] sm:$0xff] }
  0xf3   :  { %v212_v35 = vmul.f32 %v194_v31, %v194_v31  ;;  %v210_v36 = vmul.f32 %v192_v32, %v192_v32  ;;  %v193_v37 = vadd.f32 %v311_v27, %v182_v33  ;;  %v191_v38 = vadd.f32 %v311_v27, %v180_v34 }
  0xf4   :  { %v499_v39 = vadd.f32 %v203_v30, %v192_v32  ;;  %v507_v46 = vadd.f32 %v203_v30, %v194_v31 }
  0xf5   :  { %v222_v40 = vsel %vm54_vm0, %v212_v35, 0.0  ;;  %v216_v41 = vsel %vm54_vm0, %v210_v36, 0.0  ;;  %v211_v42 = vmul.f32 %v193_v37, %v193_v37  ;;  %v209_v43 = vmul.f32 %v191_v38, %v191_v38 }
  0xf6   :  { %223 = vadd.xlane.f32.xlu1 %v222_v40  ;;  %217 = vadd.xlane.f32.xlu0 %v216_v41  ;;  %v503_v44 = vadd.f32 %v203_v30, %v191_v38  ;;  %v226_v45 = vmul.f32 %v499_v39, %v499_v39  ;;  %v513_v50 = vadd.f32 %v203_v30, %v193_v37 }
  0xf7   :  { %v219_v47 = vsel %vm54_vm0, %v211_v42, 0.0  ;;  %v213_v48 = vsel %vm54_vm0, %v209_v43, 0.0  ;;  %v228_v53 = vmul.f32 %v507_v46, %v507_v46 }
  0xf8   :  { %v225_v49 = vmul.f32 %v503_v44, %v503_v44  ;;  %v232_v51 = vsel %vm54_vm0, %v226_v45, 0.0  ;;  %v227_v54 = vmul.f32 %v513_v50, %v513_v50 }
  0xf9   :  { %v238_v55 = vsel %vm54_vm0, %v228_v53, 0.0 }
  0xfa   :  { %220 = vadd.xlane.f32.xlu1 %v219_v47  ;;  %214 = vadd.xlane.f32.xlu0 %v213_v48  ;;  %v229_v52 = vsel %vm54_vm0, %v225_v49, 0.0  ;;  %v235_v56 = vsel %vm54_vm0, %v227_v54, 0.0 }
  0xfe   :  { %233 = vadd.xlane.f32.xlu1 %v232_v51  ;;  %230 = vadd.xlane.f32.xlu0 %v229_v52 }
 0x102   :  { %239 = vadd.xlane.f32.xlu1 %v238_v55  ;;  %236 = vadd.xlane.f32.xlu0 %v235_v56 }
 0x17f   :  { %v224_v57 = vpop.xlane.xlu1 %223  ;;  %v218_v58 = vpop.xlane.xlu0 %217 }
 0x180   :  { %348 = vrsqrt.f32 %v218_v58  ;;  %vm250_vm1 = vcmp.eq.f32.partialorder %v218_v58, inf  ;;  %v253_v13 = vand.u32 2147483648, %v218_v58  ;;  %vm252_vm3 = vcmp.eq.f32.partialorder %v218_v58, 0.0 }
 0x181   :  { %350 = vrsqrt.f32 %v224_v57  ;;  %vm264_vm4 = vcmp.eq.f32.partialorder %v224_v57, inf  ;;  %v267_v23 = vand.u32 2147483648, %v224_v57  ;;  %vm266_vm7 = vcmp.eq.f32.partialorder %v224_v57, 0.0 }
 0x183   :  { %v221_v59 = vpop.xlane.xlu1 %220  ;;  %v215_v60 = vpop.xlane.xlu0 %214 }
 0x184   :  { %352 = vrsqrt.f32 %v221_v59  ;;  %vm243_vm2 = vcmp.eq.f32.partialorder %v215_v60, inf  ;;  %v246_v16 = vand.u32 2147483648, %v215_v60  ;;  %vm245_vm5 = vcmp.eq.f32.partialorder %v215_v60, 0.0 }
 0x185   :  { %354 = vrsqrt.f32 %v215_v60  ;;  %vm257_vm6 = vcmp.eq.f32.partialorder %v221_v59, inf  ;;  %v260_v26 = vand.u32 2147483648, %v221_v59  ;;  %vm259_vm8 = vcmp.eq.f32.partialorder %v221_v59, 0.0 }
 0x187   :  { %v234_v61 = vpop.xlane.xlu1 %233  ;;  %v231_v62 = vpop.xlane.xlu0 %230 }
 0x188   :  { %v270_v63 = vmax.f32 %v234_v61, 1e-24  ;;  %v269_v0 = vmax.f32 %v231_v62, 1e-24 }
 0x18a   :  { %356 = vrsqrt.f32 %v270_v63 }
 0x18b   :  { %358 = vrsqrt.f32 %v269_v0  ;;  %v240_v1 = vpop.xlane.xlu1 %239  ;;  %v237_v2 = vpop.xlane.xlu0 %236 }
 0x18c   :  { %v272_v3 = vmax.f32 %v240_v1, 1e-24  ;;  %v271_v4 = vmax.f32 %v237_v2, 1e-24 }
 0x18d   :  { %v349_v5 = vpop.eup %348 }
 0x18e   :  { %360 = vrsqrt.f32 %v272_v3  ;;  %v351_v6 = vpop.eup %350  ;;  %v249_v7 = vmul.f32 %v349_v5, %v218_v58 }
 0x18f   :  { %362 = vrsqrt.f32 %v271_v4  ;;  %v263_v11 = vmul.f32 %v351_v6, %v224_v57 }
 0x190   :  { %v251_v12 = vsel %vm250_vm1, %v218_v58, %v249_v7 }
 0x191   :  { %v353_v8 = vpop.eup %352  ;;  %v254_v18 = vsel %vm252_vm3, %v253_v13, %v251_v12  ;;  %v265_v20 = vsel %vm264_vm4, %v224_v57, %v263_v11 }
 0x192   :  { %v355_v9 = vpop.eup %354  ;;  %v256_v14 = vmul.f32 %v353_v8, %v221_v59  ;;  %v268_v29 = vsel %vm266_vm7, %v267_v23, %v265_v20 }
 0x193   :  { %v242_v10 = vmul.f32 %v355_v9, %v215_v60 }
 0x194   :  { %v258_v24 = vsel %vm257_vm6, %v221_v59, %v256_v14 }
 0x195   :  { %v244_v15 = vsel %vm243_vm2, %v215_v60, %v242_v10  ;;  %v261_v32 = vsel %vm259_vm8, %v260_v26, %v258_v24 }
 0x196   :  { %v247_v21 = vsel %vm245_vm5, %v246_v16, %v244_v15 }
 0x197   :  { %v357_v17 = vpop.eup %356 }
 0x198   :  { %v359_v19 = vpop.eup %358  ;;  %v278_v22 = vmul.f32 %v357_v17, %v254_v18 }
 0x199   :  { %v277_v25 = vmul.f32 %v359_v19, %v247_v21 }
 0x19a   :  { %v282_v27 = vmul.f32 %v278_v22, %v499_v39 }
 0x19b   :  { %v361_v28 = vpop.eup %360  ;;  %v281_v30 = vmul.f32 %v277_v25, %v503_v44 }
 0x19c   :  { %v363_v31 = vpop.eup %362  ;;  %v280_v33 = vmul.f32 %v361_v28, %v268_v29  ;;  %286 = vst.msk [vmem:[#allocation9 + $0x8] sm:$0xff] %vm54_vm0, %v282_v27 }
 0x19d   :  { %v279_v34 = vmul.f32 %v363_v31, %v261_v32  ;;  %285 = vst.msk [vmem:[#allocation9] sm:$0xff] %vm54_vm0, %v281_v30 }
 0x19e   :  { %v284_v35 = vmul.f32 %v280_v33, %v507_v46 }
 0x19f   :  { %v283_v36 = vmul.f32 %v279_v34, %v513_v50 }
 0x1a0   :  { %288 = vst.msk [vmem:[#allocation9 + $0x18] sm:$0xff] %vm54_vm0, %v284_v35 }
 0x1a1   :  { %287 = vst.msk [vmem:[#allocation9 + $0x10] sm:$0xff] %vm54_vm0, %v283_v36 }
 0x1a2   :  { %415 = shalt.err (!%p412_p0)
}
 0x1a3   :  { %300 = dma.vmem_to_hbm [thread:$0]  %s295_s3, 512, %s542_s5, [#allocation6], %s431_s21, %s431_s21, %s432_s22  }
 0x1a4   :  { %428 = dma.done.wait [#allocation6], 512  }
 0x1a5   :  { %429 = vsyncadd [#allocation6], 4294966784 }
 0x1a6   :  { %304 = vsyncpa [#allocation5], 1 }
 0x1a7   :  { %305 = vsyncpa [#allocation8], 1 }
 0x1a8   :  { %306 = vsyncpa [#allocation6], 1 }

</bundles_post_ra>
